<compile_context>
chip_gen: v5e
topology: v5e:2x2
jax: 0.10.0
libtpu: 0.0.40
codegen_flags: <defaults>
</compile_context>

<pallas_src>
import math
import jax
import jax.numpy as jnp
from jax.experimental import pallas as pl
from jax.experimental.pallas import tpu as pltpu


NEG_SLOPE = 0.01  # torch.nn.LeakyReLU default


def _round_up(n, m):
    return ((n + m - 1) // m) * m


def _leaky_relu(x):
    # max(x, a*x) == LeakyReLU_a(x) for 0 < a < 1; cheaper than compare+select.
    return jnp.maximum(x, NEG_SLOPE * x)


# ---------------------------------------------------------------------------
# Kernel: fused 3-matmul MLP on one (TB, feat) batch tile.
# ---------------------------------------------------------------------------
def augmented_net_kernel(x_ref,
                         w0_ref, b0_ref,
                         w1_ref, b1_ref,
                         wf_ref, bf_ref,
                         o_ref):
    wdt = w0_ref.dtype  # f32 or bf16 weights; activations/accumulation stay f32

    # hidden layer 0  (augmented zero-columns already dropped from W0)
    h = jnp.dot(x_ref[...].astype(wdt), w0_ref[...],
                preferred_element_type=jnp.float32) + b0_ref[...]
    h = _leaky_relu(h)                      # f32 on the VPU
    # (dropout -> identity in eval)

    # hidden layer 1
    h = jnp.dot(h.astype(wdt), w1_ref[...],
                preferred_element_type=jnp.float32) + b1_ref[...]
    h = _leaky_relu(h)

    # fused (TorchNet output layer ∘ augmented output layer)
    y = jnp.dot(h.astype(wdt), wf_ref[...],
                preferred_element_type=jnp.float32) + bf_ref[...]
    o_ref[...] = y.astype(o_ref.dtype)


# ---------------------------------------------------------------------------
# Tile / VMEM sizing helpers.
# ---------------------------------------------------------------------------
def _pick_batch_tile(B, block_b):
    """Batch tile: multiple of 8 sublanes (or the full batch when B <= 8);
    prefer >= 2 grid steps so the pipeliner has something to overlap and the
    'parallel' batch axis can shard across v7x's two TensorCores."""
    if B <= 8:
        return B
    tb = max(8, (min(block_b, B) // 8) * 8)
    if tb >= B:                      # would be a single grid step
        tb = max(8, _round_up(pl.cdiv(B, 2), 8))
    return tb


def _vmem_limit_bytes(TB, in_f, out_f, kernel_params):
    """Operand-derived VMEM budget with headroom, capped at 80% of physical."""
    def slab(rows, cols, dtype):
        # VMEM tiles are (8, 128)-padded.
        return _round_up(rows, 8) * _round_up(cols, 128) * jnp.dtype(dtype).itemsize

    w_bytes = sum(slab(p.shape[0], p.shape[1], p.dtype) for p in kernel_params)
    io_bytes = slab(TB, in_f, jnp.float32) + slab(TB, out_f, jnp.float32)
    h_pad = max(p.shape[1] for p in kernel_params)
    act_bytes = 2 * slab(TB, h_pad, jnp.float32)          # in-flight activations
    # worst case: everything double-buffered (Buffered(1) fallback path)
    need = 2 * (w_bytes + io_bytes) + act_bytes

    try:
        phys = getattr(pltpu.get_tpu_info(), "vmem_capacity_bytes", None)
    except Exception:
        phys = None
    if not phys:
        phys = 64 * 1024 * 1024      # conservative: v7x per-TC physical VMEM

    return int(min(max(need + need // 4, 32 * 1024 * 1024), int(0.8 * phys)))


# ---------------------------------------------------------------------------
# Wrapper: batch-tiled pallas_call with VMEM-resident (single-buffered) weights.
# ---------------------------------------------------------------------------
def augmented_torch_net_forward(x, kernel_params, *, block_b=2048):
    w0, b0, w1, b1, wf, bf = kernel_params
    B, in_f = x.shape
    assert w0.shape[0] == in_f, "W0 rows must match (unpadded) input features"
    out_f = wf.shape[1]

    TB = _pick_batch_tile(B, block_b)
    grid = (pl.cdiv(B, TB),)           # boundary blocks are clipped on store
    vmem_limit = _vmem_limit_bytes(TB, in_f, out_f, kernel_params)

    def const_spec(a, single_buffer):
        nd = a.ndim
        idx = lambda i: (0,) * nd      # same block every step -> VMEM resident
        if single_buffer:
            return pl.BlockSpec(a.shape, idx, pipeline_mode=pl.Buffered(1))
        return pl.BlockSpec(a.shape, idx)

    def run(single_buffer_weights):
        in_specs = [pl.BlockSpec((TB, in_f), lambda i: (i, 0))] + [
            const_spec(p, single_buffer_weights) for p in kernel_params
        ]
        return pl.pallas_call(
            augmented_net_kernel,
            out_shape=jax.ShapeDtypeStruct((B, out_f), x.dtype),
            grid_spec=pltpu.PrefetchScalarGridSpec(
                num_scalar_prefetch=0,
                grid=grid,
                in_specs=in_specs,
                out_specs=pl.BlockSpec((TB, out_f), lambda i: (i, 0)),
            ),
            compiler_params=pltpu.CompilerParams(
                dimension_semantics=("parallel",),   # shard batch across TCs (v7x)
                vmem_limit_bytes=vmem_limit,
            ),
        )(x, *kernel_params)

    try:
        return run(True)
    except Exception:
        # pl.Buffered(1) (single-buffered resident weights) unsupported on this
        # jax version -> fall back to default double-buffered constant blocks.
        return run(False)


# ---------------------------------------------------------------------------
# Parameter construction (torch.nn.Linear-style) and kernel-side preparation.
# ---------------------------------------------------------------------------
def _linear_init(key, fan_in, fan_out):
    """Deterministic stand-in for torch.nn.Linear default init (U(±1/sqrt(fan_in))).
    W stored transposed as (fan_in, fan_out); b as (1, fan_out)."""
    kw, kb = jax.random.split(key)
    bound = 1.0 / math.sqrt(fan_in)
    w = jax.random.uniform(kw, (fan_in, fan_out), jnp.float32, -bound, bound)
    b = jax.random.uniform(kb, (1, fan_out), jnp.float32, -bound, bound)
    return w, b


def make_params(key, in_features, out_features, hidden, n_augment):
    """Module-faithful params: full augmented input width, 4 separate linears."""
    assert len(hidden) == 2, "this script instantiates hidden=[h0, h1]"
    in_dim = in_features + n_augment
    out_dim = out_features + n_augment
    k0, k1, k2, ka = jax.random.split(key, 4)
    p0 = _linear_init(k0, in_dim, hidden[0])
    p1 = _linear_init(k1, hidden[0], hidden[1])
    p2 = _linear_init(k2, hidden[1], out_dim)
    pa = _linear_init(ka, out_dim, out_features)
    return (p0, p1, p2, pa)


def prepare_kernel_params(params, in_features, out_features,
                          weight_dtype=jnp.float32):
    """Fold / slice / pad the module params into the kernel operand layout."""
    (w0, b0), (w1, b1), (w2, b2), (wa, ba) = params

    # (1) The augmented zero input columns only hit the last n_aug rows of W0
    #     -> drop them (bit-identical result). Keep the true input width
    #     (no K padding): the x operand is passed to the kernel unpadded.
    w0 = w0[:in_features, :]

    # (2) Fold the final two linears (no activation in between).
    wf = w2 @ wa
    bf = b2 @ wa + ba

    # (3) Pad the hidden dims to lane-dense multiples of 128. The output
    #     columns stay at out_features so the kernel writes the real output
    #     width directly (no wrapper-side slice pass).
    def pad2(a, rows, cols):
        return jnp.zeros((rows, cols), a.dtype).at[:a.shape[0], :a.shape[1]].set(a)

    h0_p = _round_up(w0.shape[1], 128)
    h1_p = _round_up(w1.shape[1], 128)

    w0p = pad2(w0, in_features, h0_p).astype(weight_dtype)
    b0p = pad2(b0, 1, h0_p)                       # biases kept f32
    w1p = pad2(w1, h0_p, h1_p).astype(weight_dtype)
    b1p = pad2(b1, 1, h1_p)
    wfp = pad2(wf, h1_p, out_features).astype(weight_dtype)
    bfp = bf.astype(jnp.float32)                  # (1, out_features)
    return (w0p, b0p, w1p, b1p, wfp, bfp)


# ---------------------------------------------------------------------------
# Pure-JAX reference implementing the ORIGINAL (unfolded, unpadded) forward.
# ---------------------------------------------------------------------------
def reference_forward(x, params, n_augment):
    B = x.shape[0]
    h = jnp.concatenate([x, jnp.zeros((B, n_augment), x.dtype)], axis=1)
    (w0, b0), (w1, b1), (w2, b2), (wa, ba) = params
    h = _leaky_relu(h @ w0 + b0)
    h = _leaky_relu(h @ w1 + b1)
    h = h @ w2 + b2
    return h @ wa + ba


if __name__ == "__main__":
    # Small shapes consistent with the module's forward.
    batch = 8
    in_features = 16
    out_features = 16
    hidden = [32, 32]
    n_augment = 4

    key = jax.random.PRNGKey(0)
    kx, kp = jax.random.split(key)
    x = jax.random.normal(kx, (batch, in_features), jnp.float32)

    params = make_params(kp, in_features, out_features, hidden, n_augment)
    # weight_dtype=jnp.bfloat16 recommended on v6e/v7x at real sizes; f32 here
    # so the 1e-5 check against the module-faithful reference holds.
    kparams = prepare_kernel_params(params, in_features, out_features,
                                    weight_dtype=jnp.float32)

    y = augmented_torch_net_forward(x, kparams)
    y = jax.block_until_ready(y)

    y_ref = reference_forward(x, params, n_augment)
    assert y.shape == (batch, out_features)
    assert jnp.allclose(y, y_ref, atol=1e-5, rtol=1e-5), "mismatch vs JAX reference"

    print("KERNEL_OK")
</pallas_src>

<mosaic_0001>
module attributes {stable_mosaic.version = 11 : i64} {
  func.func @augmented_net_kernel(%arg0: i32, %arg1: memref<8x16xf32, #tpu.memory_space<vmem>>, %arg2: memref<16x128xf32, #tpu.memory_space<vmem>>, %arg3: memref<1x128xf32, #tpu.memory_space<vmem>>, %arg4: memref<128x128xf32, #tpu.memory_space<vmem>>, %arg5: memref<1x128xf32, #tpu.memory_space<vmem>>, %arg6: memref<128x16xf32, #tpu.memory_space<vmem>>, %arg7: memref<1x16xf32, #tpu.memory_space<vmem>>, %arg8: memref<8x16xf32, #tpu.memory_space<vmem>>) attributes {dimension_semantics = [#tpu.dimension_semantics<parallel>], iteration_bounds = array<i64: 1>, scalar_prefetch = 0 : i64, scratch_operands = 0 : i64, tpu.core_type = #tpu.core_type<tc>, window_params = [{transform_indices = @transform_0, window_bounds = array<i64: 8, 16>}, {pipeline_mode = #tpu.pipeline_mode<synchronous>, transform_indices = @transform_1, window_bounds = array<i64: 16, 128>}, {pipeline_mode = #tpu.pipeline_mode<synchronous>, transform_indices = @transform_2, window_bounds = array<i64: 1, 128>}, {pipeline_mode = #tpu.pipeline_mode<synchronous>, transform_indices = @transform_3, window_bounds = array<i64: 128, 128>}, {pipeline_mode = #tpu.pipeline_mode<synchronous>, transform_indices = @transform_4, window_bounds = array<i64: 1, 128>}, {pipeline_mode = #tpu.pipeline_mode<synchronous>, transform_indices = @transform_5, window_bounds = array<i64: 128, 16>}, {pipeline_mode = #tpu.pipeline_mode<synchronous>, transform_indices = @transform_6, window_bounds = array<i64: 1, 16>}, {transform_indices = @transform_7, window_bounds = array<i64: 8, 16>}]} {
    %c0 = arith.constant 0 : index
    %c0_0 = arith.constant 0 : index
    %0 = vector.load %arg1[%c0, %c0_0] : memref<8x16xf32, #tpu.memory_space<vmem>>, vector<8x16xf32>
    %c0_1 = arith.constant 0 : index
    %c0_2 = arith.constant 0 : index
    %1 = vector.load %arg2[%c0_1, %c0_2] : memref<16x128xf32, #tpu.memory_space<vmem>>, vector<16x128xf32>
    %cst = arith.constant dense<0.000000e+00> : vector<8x128xf32>
    %2 = tpu.matmul %0, %1, %cst {dimension_numbers = #tpu.dot_dimension_numbers<[1], [0], [0], [1], [0, 0, 1, 1], [], []>} : vector<8x16xf32>, vector<16x128xf32>, vector<8x128xf32> -> vector<8x128xf32>
    %c0_3 = arith.constant 0 : index
    %c0_4 = arith.constant 0 : index
    %3 = vector.load %arg3[%c0_3, %c0_4] : memref<1x128xf32, #tpu.memory_space<vmem>>, vector<1x128xf32>
    %4 = vector.broadcast %3 : vector<1x128xf32> to vector<8x128xf32>
    %5 = arith.addf %2, %4 : vector<8x128xf32>
    %cst_5 = arith.constant 0.00999999977 : f32
    %6 = vector.broadcast %cst_5 : f32 to vector<8x128xf32>
    %7 = arith.mulf %6, %5 : vector<8x128xf32>
    %8 = arith.maximumf %5, %7 : vector<8x128xf32>
    %c0_6 = arith.constant 0 : index
    %c0_7 = arith.constant 0 : index
    %9 = vector.load %arg4[%c0_6, %c0_7] : memref<128x128xf32, #tpu.memory_space<vmem>>, vector<128x128xf32>
    %cst_8 = arith.constant dense<0.000000e+00> : vector<8x128xf32>
    %10 = tpu.matmul %8, %9, %cst_8 {dimension_numbers = #tpu.dot_dimension_numbers<[1], [0], [0], [1], [0, 0, 1, 1], [], []>} : vector<8x128xf32>, vector<128x128xf32>, vector<8x128xf32> -> vector<8x128xf32>
    %c0_9 = arith.constant 0 : index
    %c0_10 = arith.constant 0 : index
    %11 = vector.load %arg5[%c0_9, %c0_10] : memref<1x128xf32, #tpu.memory_space<vmem>>, vector<1x128xf32>
    %12 = vector.broadcast %11 : vector<1x128xf32> to vector<8x128xf32>
    %13 = arith.addf %10, %12 : vector<8x128xf32>
    %cst_11 = arith.constant 0.00999999977 : f32
    %14 = vector.broadcast %cst_11 : f32 to vector<8x128xf32>
    %15 = arith.mulf %14, %13 : vector<8x128xf32>
    %16 = arith.maximumf %13, %15 : vector<8x128xf32>
    %c0_12 = arith.constant 0 : index
    %c0_13 = arith.constant 0 : index
    %17 = vector.load %arg6[%c0_12, %c0_13] : memref<128x16xf32, #tpu.memory_space<vmem>>, vector<128x16xf32>
    %cst_14 = arith.constant dense<0.000000e+00> : vector<8x16xf32>
    %18 = tpu.matmul %16, %17, %cst_14 {dimension_numbers = #tpu.dot_dimension_numbers<[1], [0], [0], [1], [0, 0, 1, 1], [], []>} : vector<8x128xf32>, vector<128x16xf32>, vector<8x16xf32> -> vector<8x16xf32>
    %c0_15 = arith.constant 0 : index
    %c0_16 = arith.constant 0 : index
    %19 = vector.load %arg7[%c0_15, %c0_16] : memref<1x16xf32, #tpu.memory_space<vmem>>, vector<1x16xf32>
    %20 = vector.broadcast %19 : vector<1x16xf32> to vector<8x16xf32>
    %21 = arith.addf %18, %20 : vector<8x16xf32>
    %c0_17 = arith.constant 0 : index
    %c0_18 = arith.constant 0 : index
    %22 = vector.load %arg8[%c0_17, %c0_18] : memref<8x16xf32, #tpu.memory_space<vmem>>, vector<8x16xf32>
    tpu.vector_store %arg8[%c0_17, %c0_18], %21 {strides = array<i32>} : memref<8x16xf32, #tpu.memory_space<vmem>>, vector<8x16xf32>,
    return
  }
  func.func @transform_0(%arg0: i32) -> (i32, i32) {
    %c0_i32 = arith.constant 0 : i32
    %c0_i32_0 = arith.constant 0 : i32
    return %arg0, %c0_i32 : i32, i32
  }
  func.func @transform_1(%arg0: i32) -> (i32, i32) {
    %c0_i32 = arith.constant 0 : i32
    %c0_i32_0 = arith.constant 0 : i32
    %c0_i32_1 = arith.constant 0 : i32
    return %c0_i32, %c0_i32_0 : i32, i32
  }
  func.func @transform_2(%arg0: i32) -> (i32, i32) {
    %c0_i32 = arith.constant 0 : i32
    %c0_i32_0 = arith.constant 0 : i32
    %c0_i32_1 = arith.constant 0 : i32
    return %c0_i32, %c0_i32_0 : i32, i32
  }
  func.func @transform_3(%arg0: i32) -> (i32, i32) {
    %c0_i32 = arith.constant 0 : i32
    %c0_i32_0 = arith.constant 0 : i32
    %c0_i32_1 = arith.constant 0 : i32
    return %c0_i32, %c0_i32_0 : i32, i32
  }
  func.func @transform_4(%arg0: i32) -> (i32, i32) {
    %c0_i32 = arith.constant 0 : i32
    %c0_i32_0 = arith.constant 0 : i32
    %c0_i32_1 = arith.constant 0 : i32
    return %c0_i32, %c0_i32_0 : i32, i32
  }
  func.func @transform_5(%arg0: i32) -> (i32, i32) {
    %c0_i32 = arith.constant 0 : i32
    %c0_i32_0 = arith.constant 0 : i32
    %c0_i32_1 = arith.constant 0 : i32
    return %c0_i32, %c0_i32_0 : i32, i32
  }
  func.func @transform_6(%arg0: i32) -> (i32, i32) {
    %c0_i32 = arith.constant 0 : i32
    %c0_i32_0 = arith.constant 0 : i32
    %c0_i32_1 = arith.constant 0 : i32
    return %c0_i32, %c0_i32_0 : i32, i32
  }
  func.func @transform_7(%arg0: i32) -> (i32, i32) {
    %c0_i32 = arith.constant 0 : i32
    %c0_i32_0 = arith.constant 0 : i32
    return %arg0, %c0_i32 : i32, i32
  }
}

module attributes {stable_mosaic.version = 11 : i64} {
  func.func @augmented_net_kernel(%arg0: i32, %arg1: memref<8x16xf32, #tpu.memory_space<vmem>>, %arg2: memref<16x128xf32, #tpu.memory_space<vmem>>, %arg3: memref<1x128xf32, #tpu.memory_space<vmem>>, %arg4: memref<128x128xf32, #tpu.memory_space<vmem>>, %arg5: memref<1x128xf32, #tpu.memory_space<vmem>>, %arg6: memref<128x16xf32, #tpu.memory_space<vmem>>, %arg7: memref<1x16xf32, #tpu.memory_space<vmem>>, %arg8: memref<8x16xf32, #tpu.memory_space<vmem>>) attributes {dimension_semantics = [#tpu.dimension_semantics<parallel>], iteration_bounds = array<i64: 1>, scalar_prefetch = 0 : i64, scratch_operands = 0 : i64, tpu.core_type = #tpu.core_type<tc>, window_params = [{transform_indices = @transform_0, window_bounds = array<i64: 8, 16>}, {pipeline_mode = #tpu.pipeline_mode<synchronous>, transform_indices = @transform_1, window_bounds = array<i64: 16, 128>}, {pipeline_mode = #tpu.pipeline_mode<synchronous>, transform_indices = @transform_2, window_bounds = array<i64: 1, 128>}, {pipeline_mode = #tpu.pipeline_mode<synchronous>, transform_indices = @transform_3, window_bounds = array<i64: 128, 128>}, {pipeline_mode = #tpu.pipeline_mode<synchronous>, transform_indices = @transform_4, window_bounds = array<i64: 1, 128>}, {pipeline_mode = #tpu.pipeline_mode<synchronous>, transform_indices = @transform_5, window_bounds = array<i64: 128, 16>}, {pipeline_mode = #tpu.pipeline_mode<synchronous>, transform_indices = @transform_6, window_bounds = array<i64: 1, 16>}, {transform_indices = @transform_7, window_bounds = array<i64: 8, 16>}]} {
    %c0 = arith.constant 0 : index
    %c0_0 = arith.constant 0 : index
    %0 = vector.load %arg1[%c0, %c0_0] : memref<8x16xf32, #tpu.memory_space<vmem>>, vector<8x16xf32>
    %c0_1 = arith.constant 0 : index
    %c0_2 = arith.constant 0 : index
    %1 = vector.load %arg2[%c0_1, %c0_2] : memref<16x128xf32, #tpu.memory_space<vmem>>, vector<16x128xf32>
    %cst = arith.constant dense<0.000000e+00> : vector<8x128xf32>
    %2 = tpu.matmul %0, %1, %cst {dimension_numbers = #tpu.dot_dimension_numbers<[1], [0], [0], [1], [0, 0, 1, 1], [], []>} : vector<8x16xf32>, vector<16x128xf32>, vector<8x128xf32> -> vector<8x128xf32>
    %c0_3 = arith.constant 0 : index
    %c0_4 = arith.constant 0 : index
    %3 = vector.load %arg3[%c0_3, %c0_4] : memref<1x128xf32, #tpu.memory_space<vmem>>, vector<1x128xf32>
    %4 = vector.broadcast %3 : vector<1x128xf32> to vector<8x128xf32>
    %5 = arith.addf %2, %4 : vector<8x128xf32>
    %cst_5 = arith.constant 0.00999999977 : f32
    %6 = vector.broadcast %cst_5 : f32 to vector<8x128xf32>
    %7 = arith.mulf %6, %5 : vector<8x128xf32>
    %8 = arith.maximumf %5, %7 : vector<8x128xf32>
    %c0_6 = arith.constant 0 : index
    %c0_7 = arith.constant 0 : index
    %9 = vector.load %arg4[%c0_6, %c0_7] : memref<128x128xf32, #tpu.memory_space<vmem>>, vector<128x128xf32>
    %cst_8 = arith.constant dense<0.000000e+00> : vector<8x128xf32>
    %10 = tpu.matmul %8, %9, %cst_8 {dimension_numbers = #tpu.dot_dimension_numbers<[1], [0], [0], [1], [0, 0, 1, 1], [], []>} : vector<8x128xf32>, vector<128x128xf32>, vector<8x128xf32> -> vector<8x128xf32>
    %c0_9 = arith.constant 0 : index
    %c0_10 = arith.constant 0 : index
    %11 = vector.load %arg5[%c0_9, %c0_10] : memref<1x128xf32, #tpu.memory_space<vmem>>, vector<1x128xf32>
    %12 = vector.broadcast %11 : vector<1x128xf32> to vector<8x128xf32>
    %13 = arith.addf %10, %12 : vector<8x128xf32>
    %cst_11 = arith.constant 0.00999999977 : f32
    %14 = vector.broadcast %cst_11 : f32 to vector<8x128xf32>
    %15 = arith.mulf %14, %13 : vector<8x128xf32>
    %16 = arith.maximumf %13, %15 : vector<8x128xf32>
    %c0_12 = arith.constant 0 : index
    %c0_13 = arith.constant 0 : index
    %17 = vector.load %arg6[%c0_12, %c0_13] : memref<128x16xf32, #tpu.memory_space<vmem>>, vector<128x16xf32>
    %cst_14 = arith.constant dense<0.000000e+00> : vector<8x16xf32>
    %18 = tpu.matmul %16, %17, %cst_14 {dimension_numbers = #tpu.dot_dimension_numbers<[1], [0], [0], [1], [0, 0, 1, 1], [], []>} : vector<8x128xf32>, vector<128x16xf32>, vector<8x16xf32> -> vector<8x16xf32>
    %c0_15 = arith.constant 0 : index
    %c0_16 = arith.constant 0 : index
    %19 = vector.load %arg7[%c0_15, %c0_16] : memref<1x16xf32, #tpu.memory_space<vmem>>, vector<1x16xf32>
    %20 = vector.broadcast %19 : vector<1x16xf32> to vector<8x16xf32>
    %21 = arith.addf %18, %20 : vector<8x16xf32>
    %c0_17 = arith.constant 0 : index
    %c0_18 = arith.constant 0 : index
    %22 = vector.load %arg8[%c0_17, %c0_18] : memref<8x16xf32, #tpu.memory_space<vmem>>, vector<8x16xf32>
    tpu.vector_store %arg8[%c0_17, %c0_18], %21 {strides = array<i32>} : memref<8x16xf32, #tpu.memory_space<vmem>>, vector<8x16xf32>,
    return
  }
  func.func @transform_0(%arg0: i32) -> (i32, i32) {
    %c0_i32 = arith.constant 0 : i32
    %c0_i32_0 = arith.constant 0 : i32
    return %arg0, %c0_i32 : i32, i32
  }
  func.func @transform_1(%arg0: i32) -> (i32, i32) {
    %c0_i32 = arith.constant 0 : i32
    %c0_i32_0 = arith.constant 0 : i32
    %c0_i32_1 = arith.constant 0 : i32
    return %c0_i32, %c0_i32_0 : i32, i32
  }
  func.func @transform_2(%arg0: i32) -> (i32, i32) {
    %c0_i32 = arith.constant 0 : i32
    %c0_i32_0 = arith.constant 0 : i32
    %c0_i32_1 = arith.constant 0 : i32
    return %c0_i32, %c0_i32_0 : i32, i32
  }
  func.func @transform_3(%arg0: i32) -> (i32, i32) {
    %c0_i32 = arith.constant 0 : i32
    %c0_i32_0 = arith.constant 0 : i32
    %c0_i32_1 = arith.constant 0 : i32
    return %c0_i32, %c0_i32_0 : i32, i32
  }
  func.func @transform_4(%arg0: i32) -> (i32, i32) {
    %c0_i32 = arith.constant 0 : i32
    %c0_i32_0 = arith.constant 0 : i32
    %c0_i32_1 = arith.constant 0 : i32
    return %c0_i32, %c0_i32_0 : i32, i32
  }
  func.func @transform_5(%arg0: i32) -> (i32, i32) {
    %c0_i32 = arith.constant 0 : i32
    %c0_i32_0 = arith.constant 0 : i32
    %c0_i32_1 = arith.constant 0 : i32
    return %c0_i32, %c0_i32_0 : i32, i32
  }
  func.func @transform_6(%arg0: i32) -> (i32, i32) {
    %c0_i32 = arith.constant 0 : i32
    %c0_i32_0 = arith.constant 0 : i32
    %c0_i32_1 = arith.constant 0 : i32
    return %c0_i32, %c0_i32_0 : i32, i32
  }
  func.func @transform_7(%arg0: i32) -> (i32, i32) {
    %c0_i32 = arith.constant 0 : i32
    %c0_i32_0 = arith.constant 0 : i32
    return %arg0, %c0_i32 : i32, i32
  }
}

</mosaic_0001>

<bundles_post_ra>
// kernel: tpu_custom_call.1
= control target key start
LH: loop header
LB: loop body
LE: loop exit
PB: predicated region body
PF: predicated region fallthrough
CT: control target
= control target key end

     0   :  { %12 = vsyncpa [#allocation3], 0  ;;  %s393_s0 = inlined_call_operand.hbm [shape: f32[8,16], index: 0, kind: input, shape index: {}]   ;;  %s394_s1 = inlined_call_operand.vmem [shape: f32[16,128], index: 1, kind: input, shape index: {}]   ;;  %s395_s2 = inlined_call_operand.vmem [shape: f32[1,128], index: 2, kind: input, shape index: {}]   ;;  %s396_s3 = inlined_call_operand.vmem [shape: f32[128,128], index: 3, kind: input, shape index: {}]   ;;  %s397_s4 = inlined_call_operand.vmem [shape: f32[1,128], index: 4, kind: input, shape index: {}]   ;;  %s398_s5 = inlined_call_operand.vmem [shape: f32[128,16], index: 5, kind: input, shape index: {}]   ;;  %s399_s6 = inlined_call_operand.vmem [shape: f32[1,16], index: 6, kind: input, shape index: {}]   ;;  %s400_s7 = inlined_call_operand.hbm [shape: f32[8,16], index: 7, kind: output, shape index: {}]  }
   0x1   :  { %13 = vsyncpa [#allocation4], 0  ;;  %s19_s26 = sshll.u32 %s393_s0, 4  ;;  %s232_s27 = smov [#allocation2]   ;;  %s20_s26 = int_to_ptr.hbm [resolvable:$true] %s19_s26 }
   0x2   :  { %s21_s28 = sshll.u32 %s232_s27, 4  ;;  %s22_s28 = int_to_ptr.vmem [resolvable:$true] %s21_s28 }
   0x3   :  { %24 = dma.hbm_to_vmem [thread:$0]  %s20_s26, 128, %s22_s28, [#allocation3]  }
   0x4   :  { %228 = dma.done.wait [#allocation3], 128  }
   0x5   :  { %229 = vsyncadd [#allocation3], 4294967168  ;;  %v43_v0 = vld [vmem:[%s394_s1 + $0x8] sm:$0xff]  ;;  %v42_v1 = vld [vmem:[%s394_s1] sm:$0xff]  ;;  %vm48_vm0 = vcmask 130048   ;;  %s233_s25 = smov [#allocation5]  }
   0x6   :  { %66 = vmatpush.msra.mxu0 %v43_v0  ;;  %v41_v2 = vld [vmem:[#allocation2] sm:$0xff]  ;;  %v89_v3 = vld [vmem:[%s396_s3 + $0x78] sm:$0xff]  ;;  %v88_v4 = vld [vmem:[%s396_s3 + $0x70] sm:$0xff]  ;;  %s162_s26 = sshll.u32 %s233_s25, 4  ;;  %s163_s26 = int_to_ptr.vmem [resolvable:$true] %s162_s26 }
   0x7   :  { %94 = vmatpush.msra.mxu1 %v89_v3  ;;  %v87_v5 = vld [vmem:[%s396_s3 + $0x68] sm:$0xff]  ;;  %v86_v6 = vld [vmem:[%s396_s3 + $0x60] sm:$0xff]  ;;  %v85_v7 = vld [vmem:[%s396_s3 + $0x58] sm:$0xff] }
   0x8   :  { %67 = vmatpush.msra.mxu0 %v42_v1  ;;  %v84_v8 = vld [vmem:[%s396_s3 + $0x50] sm:$0xff]  ;;  %v83_v9 = vld [vmem:[%s396_s3 + $0x48] sm:$0xff]  ;;  %v82_v10 = vld [vmem:[%s396_s3 + $0x40] sm:$0xff] }
   0x9   :  { %174 = vmatmul.msk.f32.vlgmr.msra.gmra.mxu0 %vm48_vm0, %v41_v2  ;;  %95 = vmatpush.msra.mxu1 %v88_v4  ;;  %v81_v11 = vld [vmem:[%s396_s3 + $0x38] sm:$0xff]  ;;  %v80_v12 = vld [vmem:[%s396_s3 + $0x30] sm:$0xff]  ;;  %v79_v13 = vld [vmem:[%s396_s3 + $0x28] sm:$0xff] }
   0xa   :  { %v78_v14 = vld [vmem:[%s396_s3 + $0x20] sm:$0xff]  ;;  %v77_v15 = vld [vmem:[%s396_s3 + $0x18] sm:$0xff]  ;;  %v76_v16 = vld [vmem:[%s396_s3 + $0x10] sm:$0xff] }
   0xb   :  { %96 = vmatpush.msra.mxu1 %v87_v5  ;;  %v75_v17 = vld [vmem:[%s396_s3 + $0x8] sm:$0xff]  ;;  %v74_v18 = vld [vmem:[%s396_s3] sm:$0xff]  ;;  %v131_v19 = vld [vmem:[%s398_s5 + $0x78] sm:$0xff] }
   0xc   :  { %v130_v20 = vld [vmem:[%s398_s5 + $0x70] sm:$0xff]  ;;  %136 = vmatpush.msra.mxu2 %v131_v19  ;;  %v129_v21 = vld [vmem:[%s398_s5 + $0x68] sm:$0xff]  ;;  %v128_v22 = vld [vmem:[%s398_s5 + $0x60] sm:$0xff] }
   0xd   :  { %97 = vmatpush.msra.mxu1 %v86_v6  ;;  %v127_v23 = vld [vmem:[%s398_s5 + $0x58] sm:$0xff]  ;;  %v126_v24 = vld [vmem:[%s398_s5 + $0x50] sm:$0xff]  ;;  %v125_v25 = vld [vmem:[%s398_s5 + $0x48] sm:$0xff] }
   0xe   :  { %137 = vmatpush.msra.mxu2 %v130_v20  ;;  %v124_v26 = vld [vmem:[%s398_s5 + $0x40] sm:$0xff]  ;;  %v123_v27 = vld [vmem:[%s398_s5 + $0x38] sm:$0xff]  ;;  %v122_v28 = vld [vmem:[%s398_s5 + $0x30] sm:$0xff] }
   0xf   :  { %98 = vmatpush.msra.mxu1 %v85_v7  ;;  %v121_v29 = vld [vmem:[%s398_s5 + $0x28] sm:$0xff]  ;;  %v120_v30 = vld [vmem:[%s398_s5 + $0x20] sm:$0xff]  ;;  %v119_v36 = vld [vmem:[%s398_s5 + $0x18] sm:$0xff] }
  0x10   :  { %138 = vmatpush.msra.mxu2 %v129_v21  ;;  %v177_v31 = vld [vmem:[%s395_s2] ss:$0 sm:$0xff]  ;;  %v118_v37 = vld [vmem:[%s398_s5 + $0x10] sm:$0xff]  ;;  %v117_v38 = vld [vmem:[%s398_s5 + $0x8] sm:$0xff] }
  0x11   :  { %99 = vmatpush.msra.mxu1 %v84_v8  ;;  %v116_v39 = vld [vmem:[%s398_s5] sm:$0xff]  ;;  %s164_s5 = sshll.u32 %s400_s7, 4  ;;  %s165_s5 = int_to_ptr.hbm [resolvable:$true] %s164_s5 }
  0x12   :  { %139 = vmatpush.msra.mxu2 %v128_v22  ;;  %v178_v40 = vld [vmem:[%s397_s4] ss:$0 sm:$0xff] }
  0x13   :  { %100 = vmatpush.msra.mxu1 %v83_v9  ;;  %v179_v45 = vld [vmem:[%s399_s6] ss:$0 sm:$0xff] }
  0x14   :  { %140 = vmatpush.msra.mxu2 %v127_v23 }
  0x15   :  { %101 = vmatpush.msra.mxu1 %v82_v10 }
  0x16   :  { %141 = vmatpush.msra.mxu2 %v126_v24 }
  0x17   :  { %102 = vmatpush.msra.mxu1 %v81_v11 }
  0x18   :  { %142 = vmatpush.msra.mxu2 %v125_v25 }
  0x19   :  { %103 = vmatpush.msra.mxu1 %v80_v12 }
  0x1a   :  { %143 = vmatpush.msra.mxu2 %v124_v26 }
  0x1b   :  { %104 = vmatpush.msra.mxu1 %v79_v13 }
  0x1c   :  { %144 = vmatpush.msra.mxu2 %v123_v27 }
  0x1d   :  { %105 = vmatpush.msra.mxu1 %v78_v14 }
  0x1e   :  { %145 = vmatpush.msra.mxu2 %v122_v28 }
  0x1f   :  { %106 = vmatpush.msra.mxu1 %v77_v15 }
  0x20   :  { %146 = vmatpush.msra.mxu2 %v121_v29 }
  0x21   :  { %107 = vmatpush.msra.mxu1 %v76_v16 }
  0x22   :  { %147 = vmatpush.msra.mxu2 %v120_v30 }
  0x23   :  { %108 = vmatpush.msra.mxu1 %v75_v17 }
  0x24   :  { %148 = vmatpush.msra.mxu2 %v119_v36 }
  0x25   :  { %109 = vmatpush.msra.mxu1 %v74_v18 }
  0x26   :  { %149 = vmatpush.msra.mxu2 %v118_v37 }
  0x28   :  { %150 = vmatpush.msra.mxu2 %v117_v38 }
  0x2a   :  { %151 = vmatpush.msra.mxu2 %v116_v39 }
  0x86   :  { %v69_v32 = vpop.f32.mrf.mxu0 }
  0x87   :  { %v70_v33 = vadd.f32 %v177_v31, %v69_v32 }
  0x89   :  { %v72_v34 = vmul.f32 0.01, %v70_v33 }
  0x8b   :  { %v73_v35 = vmax.f32 %v70_v33, %v72_v34 }
  0x8d   :  { %110 = vmatmul.f32.vlgmr.msra.gmra.mxu1 %v73_v35 }
 0x10a   :  { %v111_v41 = vpop.f32.mrf.mxu1 }
 0x10b   :  { %v112_v42 = vadd.f32 %v178_v40, %v111_v41 }
 0x10d   :  { %v114_v43 = vmul.f32 0.01, %v112_v42 }
 0x10f   :  { %v115_v44 = vmax.f32 %v112_v42, %v114_v43 }
 0x111   :  { %152 = vmatmul.f32.vlgmr.msra.gmra.mxu2 %v115_v44 }
 0x194   :  { %v153_v46 = vpop.f32.mrf.mxu2 }
 0x195   :  { %v154_v47 = vadd.f32 %v179_v45, %v153_v46 }
 0x197   :  { %156 = vst.msk [vmem:[#allocation5] sm:$0xff] %vm48_vm0, %v154_v47 }
 0x198   :  { %167 = dma.vmem_to_hbm [thread:$0]  %s163_s26, 128, %s165_s5, [#allocation4]  }
 0x199   :  { %230 = dma.done.wait [#allocation4], 128  }
 0x19a   :  { %231 = vsyncadd [#allocation4], 4294967168 }
 0x19b   :  { %172 = vsyncpa [#allocation3], 1 }
 0x19c   :  { %173 = vsyncpa [#allocation4], 1 }

// kernel: tpu_custom_call.1
= control target key start
LH: loop header
LB: loop body
LE: loop exit
PB: predicated region body
PF: predicated region fallthrough
CT: control target
= control target key end

     0   :  { %12 = vsyncpa [#allocation3], 0  ;;  %s393_s0 = inlined_call_operand.hbm [shape: f32[8,16], index: 0, kind: input, shape index: {}]   ;;  %s394_s1 = inlined_call_operand.vmem [shape: f32[16,128], index: 1, kind: input, shape index: {}]   ;;  %s395_s2 = inlined_call_operand.vmem [shape: f32[1,128], index: 2, kind: input, shape index: {}]   ;;  %s396_s3 = inlined_call_operand.vmem [shape: f32[128,128], index: 3, kind: input, shape index: {}]   ;;  %s397_s4 = inlined_call_operand.vmem [shape: f32[1,128], index: 4, kind: input, shape index: {}]   ;;  %s398_s5 = inlined_call_operand.vmem [shape: f32[128,16], index: 5, kind: input, shape index: {}]   ;;  %s399_s6 = inlined_call_operand.vmem [shape: f32[1,16], index: 6, kind: input, shape index: {}]   ;;  %s400_s7 = inlined_call_operand.hbm [shape: f32[8,16], index: 7, kind: output, shape index: {}]  }
   0x1   :  { %13 = vsyncpa [#allocation4], 0  ;;  %s19_s26 = sshll.u32 %s393_s0, 4  ;;  %s232_s27 = smov [#allocation2]   ;;  %s20_s26 = int_to_ptr.hbm [resolvable:$true] %s19_s26 }
   0x2   :  { %s21_s28 = sshll.u32 %s232_s27, 4  ;;  %s22_s28 = int_to_ptr.vmem [resolvable:$true] %s21_s28 }
   0x3   :  { %24 = dma.hbm_to_vmem [thread:$0]  %s20_s26, 128, %s22_s28, [#allocation3]  }
   0x4   :  { %228 = dma.done.wait [#allocation3], 128  }
   0x5   :  { %229 = vsyncadd [#allocation3], 4294967168  ;;  %v43_v0 = vld [vmem:[%s394_s1 + $0x8] sm:$0xff]  ;;  %v42_v1 = vld [vmem:[%s394_s1] sm:$0xff]  ;;  %vm48_vm0 = vcmask 130048   ;;  %s233_s25 = smov [#allocation5]  }
   0x6   :  { %66 = vmatpush.msra.mxu0 %v43_v0  ;;  %v41_v2 = vld [vmem:[#allocation2] sm:$0xff]  ;;  %v89_v3 = vld [vmem:[%s396_s3 + $0x78] sm:$0xff]  ;;  %v88_v4 = vld [vmem:[%s396_s3 + $0x70] sm:$0xff]  ;;  %s162_s26 = sshll.u32 %s233_s25, 4  ;;  %s163_s26 = int_to_ptr.vmem [resolvable:$true] %s162_s26 }
   0x7   :  { %94 = vmatpush.msra.mxu1 %v89_v3  ;;  %v87_v5 = vld [vmem:[%s396_s3 + $0x68] sm:$0xff]  ;;  %v86_v6 = vld [vmem:[%s396_s3 + $0x60] sm:$0xff]  ;;  %v85_v7 = vld [vmem:[%s396_s3 + $0x58] sm:$0xff] }
   0x8   :  { %67 = vmatpush.msra.mxu0 %v42_v1  ;;  %v84_v8 = vld [vmem:[%s396_s3 + $0x50] sm:$0xff]  ;;  %v83_v9 = vld [vmem:[%s396_s3 + $0x48] sm:$0xff]  ;;  %v82_v10 = vld [vmem:[%s396_s3 + $0x40] sm:$0xff] }
   0x9   :  { %174 = vmatmul.msk.f32.vlgmr.msra.gmra.mxu0 %vm48_vm0, %v41_v2  ;;  %95 = vmatpush.msra.mxu1 %v88_v4  ;;  %v81_v11 = vld [vmem:[%s396_s3 + $0x38] sm:$0xff]  ;;  %v80_v12 = vld [vmem:[%s396_s3 + $0x30] sm:$0xff]  ;;  %v79_v13 = vld [vmem:[%s396_s3 + $0x28] sm:$0xff] }
   0xa   :  { %v78_v14 = vld [vmem:[%s396_s3 + $0x20] sm:$0xff]  ;;  %v77_v15 = vld [vmem:[%s396_s3 + $0x18] sm:$0xff]  ;;  %v76_v16 = vld [vmem:[%s396_s3 + $0x10] sm:$0xff] }
   0xb   :  { %96 = vmatpush.msra.mxu1 %v87_v5  ;;  %v75_v17 = vld [vmem:[%s396_s3 + $0x8] sm:$0xff]  ;;  %v74_v18 = vld [vmem:[%s396_s3] sm:$0xff]  ;;  %v131_v19 = vld [vmem:[%s398_s5 + $0x78] sm:$0xff] }
   0xc   :  { %v130_v20 = vld [vmem:[%s398_s5 + $0x70] sm:$0xff]  ;;  %136 = vmatpush.msra.mxu2 %v131_v19  ;;  %v129_v21 = vld [vmem:[%s398_s5 + $0x68] sm:$0xff]  ;;  %v128_v22 = vld [vmem:[%s398_s5 + $0x60] sm:$0xff] }
   0xd   :  { %97 = vmatpush.msra.mxu1 %v86_v6  ;;  %v127_v23 = vld [vmem:[%s398_s5 + $0x58] sm:$0xff]  ;;  %v126_v24 = vld [vmem:[%s398_s5 + $0x50] sm:$0xff]  ;;  %v125_v25 = vld [vmem:[%s398_s5 + $0x48] sm:$0xff] }
   0xe   :  { %137 = vmatpush.msra.mxu2 %v130_v20  ;;  %v124_v26 = vld [vmem:[%s398_s5 + $0x40] sm:$0xff]  ;;  %v123_v27 = vld [vmem:[%s398_s5 + $0x38] sm:$0xff]  ;;  %v122_v28 = vld [vmem:[%s398_s5 + $0x30] sm:$0xff] }
   0xf   :  { %98 = vmatpush.msra.mxu1 %v85_v7  ;;  %v121_v29 = vld [vmem:[%s398_s5 + $0x28] sm:$0xff]  ;;  %v120_v30 = vld [vmem:[%s398_s5 + $0x20] sm:$0xff]  ;;  %v119_v36 = vld [vmem:[%s398_s5 + $0x18] sm:$0xff] }
  0x10   :  { %138 = vmatpush.msra.mxu2 %v129_v21  ;;  %v177_v31 = vld [vmem:[%s395_s2] ss:$0 sm:$0xff]  ;;  %v118_v37 = vld [vmem:[%s398_s5 + $0x10] sm:$0xff]  ;;  %v117_v38 = vld [vmem:[%s398_s5 + $0x8] sm:$0xff] }
  0x11   :  { %99 = vmatpush.msra.mxu1 %v84_v8  ;;  %v116_v39 = vld [vmem:[%s398_s5] sm:$0xff]  ;;  %s164_s5 = sshll.u32 %s400_s7, 4  ;;  %s165_s5 = int_to_ptr.hbm [resolvable:$true] %s164_s5 }
  0x12   :  { %139 = vmatpush.msra.mxu2 %v128_v22  ;;  %v178_v40 = vld [vmem:[%s397_s4] ss:$0 sm:$0xff] }
  0x13   :  { %100 = vmatpush.msra.mxu1 %v83_v9  ;;  %v179_v45 = vld [vmem:[%s399_s6] ss:$0 sm:$0xff] }
  0x14   :  { %140 = vmatpush.msra.mxu2 %v127_v23 }
  0x15   :  { %101 = vmatpush.msra.mxu1 %v82_v10 }
  0x16   :  { %141 = vmatpush.msra.mxu2 %v126_v24 }
  0x17   :  { %102 = vmatpush.msra.mxu1 %v81_v11 }
  0x18   :  { %142 = vmatpush.msra.mxu2 %v125_v25 }
  0x19   :  { %103 = vmatpush.msra.mxu1 %v80_v12 }
  0x1a   :  { %143 = vmatpush.msra.mxu2 %v124_v26 }
  0x1b   :  { %104 = vmatpush.msra.mxu1 %v79_v13 }
  0x1c   :  { %144 = vmatpush.msra.mxu2 %v123_v27 }
  0x1d   :  { %105 = vmatpush.msra.mxu1 %v78_v14 }
  0x1e   :  { %145 = vmatpush.msra.mxu2 %v122_v28 }
  0x1f   :  { %106 = vmatpush.msra.mxu1 %v77_v15 }
  0x20   :  { %146 = vmatpush.msra.mxu2 %v121_v29 }
  0x21   :  { %107 = vmatpush.msra.mxu1 %v76_v16 }
  0x22   :  { %147 = vmatpush.msra.mxu2 %v120_v30 }
  0x23   :  { %108 = vmatpush.msra.mxu1 %v75_v17 }
  0x24   :  { %148 = vmatpush.msra.mxu2 %v119_v36 }
  0x25   :  { %109 = vmatpush.msra.mxu1 %v74_v18 }
  0x26   :  { %149 = vmatpush.msra.mxu2 %v118_v37 }
  0x28   :  { %150 = vmatpush.msra.mxu2 %v117_v38 }
  0x2a   :  { %151 = vmatpush.msra.mxu2 %v116_v39 }
  0x86   :  { %v69_v32 = vpop.f32.mrf.mxu0 }
  0x87   :  { %v70_v33 = vadd.f32 %v177_v31, %v69_v32 }
  0x89   :  { %v72_v34 = vmul.f32 0.01, %v70_v33 }
  0x8b   :  { %v73_v35 = vmax.f32 %v70_v33, %v72_v34 }
  0x8d   :  { %110 = vmatmul.f32.vlgmr.msra.gmra.mxu1 %v73_v35 }
 0x10a   :  { %v111_v41 = vpop.f32.mrf.mxu1 }
 0x10b   :  { %v112_v42 = vadd.f32 %v178_v40, %v111_v41 }
 0x10d   :  { %v114_v43 = vmul.f32 0.01, %v112_v42 }
 0x10f   :  { %v115_v44 = vmax.f32 %v112_v42, %v114_v43 }
 0x111   :  { %152 = vmatmul.f32.vlgmr.msra.gmra.mxu2 %v115_v44 }
 0x194   :  { %v153_v46 = vpop.f32.mrf.mxu2 }
 0x195   :  { %v154_v47 = vadd.f32 %v179_v45, %v153_v46 }
 0x197   :  { %156 = vst.msk [vmem:[#allocation5] sm:$0xff] %vm48_vm0, %v154_v47 }
 0x198   :  { %167 = dma.vmem_to_hbm [thread:$0]  %s163_s26, 128, %s165_s5, [#allocation4]  }
 0x199   :  { %230 = dma.done.wait [#allocation4], 128  }
 0x19a   :  { %231 = vsyncadd [#allocation4], 4294967168 }
 0x19b   :  { %172 = vsyncpa [#allocation3], 1 }
 0x19c   :  { %173 = vsyncpa [#allocation4], 1 }

</bundles_post_ra>
